<compile_context>
chip_gen: v6e
topology: v6e:2x2x1
jax: 0.10.0
libtpu: 0.0.40
codegen_flags: <defaults>
</compile_context>

<pallas_src>
import functools

import jax
import jax.numpy as jnp
from jax.experimental import pallas as pl
from jax.experimental.pallas import tpu as pltpu


# ---------------------------------------------------------------------------
# Kernel
# ---------------------------------------------------------------------------
def _pnn_column_kernel(x_ref, lat_ref, w1_ref, w2_ref, w23_ref, bias_ref, out_ref,
                       *, hidden, out_pad, out_dim):
    # fc1 (+ folded BN1) + ReLU ; dropout is identity in eval mode
    h = jnp.dot(x_ref[...].astype(jnp.bfloat16), w1_ref[...],
                preferred_element_type=jnp.float32)
    h = jnp.maximum(h + bias_ref[0:1, :hidden], 0.0)

    # fc2 (+ folded BN2) + ReLU
    h = jnp.dot(h.astype(jnp.bfloat16), w2_ref[...],
                preferred_element_type=jnp.float32)
    h = jnp.maximum(h + bias_ref[1:2, :hidden], 0.0)

    # Output stage: (h2 + lat@Wl + bl) @ W3 + b3
    #             == h2 @ W3  +  lat @ (Wl@W3)  +  (b3 + bl@W3)
    # Two accumulating dots against static row-slices of the stacked weight —
    # no lane concatenate, no staging buffers.
    out = jnp.dot(h.astype(jnp.bfloat16), w23_ref[:hidden, :],
                  preferred_element_type=jnp.float32)
    out = out + jnp.dot(lat_ref[...].astype(jnp.bfloat16), w23_ref[hidden:, :],
                        preferred_element_type=jnp.float32)
    out = out + bias_ref[2:3, :out_pad]

    # Narrow store: only the real logits columns go back to HBM.
    out_ref[...] = out[:, :out_dim].astype(out_ref.dtype)


# ---------------------------------------------------------------------------
# Wrapper
# ---------------------------------------------------------------------------
def _round_up(n, m):
    return ((n + m - 1) // m) * m


def pnn_column_fc2_forward(x, lateral, packed):
    """x: (B, input_size) f32, lateral: (B, hidden) f32 -> (B, new_output) f32."""
    w1, w2, w23, bias = packed["w1"], packed["w2"], packed["w23"], packed["bias"]
    in_size, hidden = w1.shape
    out_pad = w23.shape[1]
    out_dim = packed["out_dim"]
    bias_w = bias.shape[1]

    B = x.shape[0]
    if B <= 1024:
        tb, nb = B, 1                    # single tile; full-dim block is legal
    else:
        tb = 1024                        # large tile: amortizes per-step overhead,
        nb = pl.cdiv(B, tb)              # fills 256-row MXU; ragged tail handled
        # TODO(synk): on v7x an even grid length balances the two TensorCores
        # best; nb here is whatever cdiv gives — acceptable at large B.

    kernel = functools.partial(_pnn_column_kernel,
                               hidden=hidden, out_pad=out_pad, out_dim=out_dim)

    out = pl.pallas_call(
        kernel,
        out_shape=jax.ShapeDtypeStruct((B, out_dim), jnp.float32),
        grid=(nb,),
        in_specs=[
            pl.BlockSpec((tb, in_size), lambda i: (i, 0)),          # x tile (no pad)
            pl.BlockSpec((tb, hidden), lambda i: (i, 0)),           # lateral tile
            pl.BlockSpec((in_size, hidden), lambda i: (0, 0)),      # W1 (BN1 folded), bf16
            pl.BlockSpec((hidden, hidden), lambda i: (0, 0)),       # W2 (BN2 folded), bf16
            pl.BlockSpec((2 * hidden, out_pad), lambda i: (0, 0)),  # [W3 ; Wl@W3], bf16
            pl.BlockSpec((8, bias_w), lambda i: (0, 0)),            # packed biases, f32
        ],
        out_specs=pl.BlockSpec((tb, out_dim), lambda i: (i, 0)),    # narrow logits
        compiler_params=pltpu.CompilerParams(dimension_semantics=("parallel",)),
    )(x.astype(jnp.float32), lateral.astype(jnp.float32), w1, w2, w23, bias)

    return out


# ---------------------------------------------------------------------------
# Parameter construction / packing (host side)
# ---------------------------------------------------------------------------
def _xavier_uniform(key, fan_in, fan_out):
    limit = jnp.sqrt(6.0 / (fan_in + fan_out))
    # stored as (in, out) so the kernel computes x @ W directly
    return jax.random.uniform(key, (fan_in, fan_out), jnp.float32, -limit, limit)


def make_raw_params(key, input_size, hidden, out_dim):
    ks = jax.random.split(key, 12)
    return dict(
        # Linear layers: xavier-uniform weights, zero biases (matches init_weights)
        w1=_xavier_uniform(ks[0], input_size, hidden), b1=jnp.zeros((hidden,), jnp.float32),
        w2=_xavier_uniform(ks[1], hidden, hidden),     b2=jnp.zeros((hidden,), jnp.float32),
        wl=_xavier_uniform(ks[2], hidden, hidden),     bl=jnp.zeros((hidden,), jnp.float32),
        w3=_xavier_uniform(ks[3], hidden, out_dim),    b3=jnp.zeros((out_dim,), jnp.float32),
        # BatchNorm1d (eval mode) running statistics / affine params
        gamma1=1.0 + 0.1 * jax.random.normal(ks[4], (hidden,), jnp.float32),
        beta1=0.05 * jax.random.normal(ks[5], (hidden,), jnp.float32),
        mean1=0.1 * jax.random.normal(ks[6], (hidden,), jnp.float32),
        var1=1.0 + 0.1 * jnp.abs(jax.random.normal(ks[7], (hidden,), jnp.float32)),
        gamma2=1.0 + 0.1 * jax.random.normal(ks[8], (hidden,), jnp.float32),
        beta2=0.05 * jax.random.normal(ks[9], (hidden,), jnp.float32),
        mean2=0.1 * jax.random.normal(ks[10], (hidden,), jnp.float32),
        var2=1.0 + 0.1 * jnp.abs(jax.random.normal(ks[11], (hidden,), jnp.float32)),
    )


def pack_params(raw, eps=1e-5, lane=128):
    in_size, hidden = raw["w1"].shape
    out_dim = raw["w3"].shape[1]
    out_pad = _round_up(out_dim, lane)

    # Fold BatchNorm (running stats) into the preceding Linear layer.
    s1 = raw["gamma1"] / jnp.sqrt(raw["var1"] + eps)
    t1 = raw["beta1"] - raw["mean1"] * s1
    s2 = raw["gamma2"] / jnp.sqrt(raw["var2"] + eps)
    t2 = raw["beta2"] - raw["mean2"] * s2

    w1f = raw["w1"] * s1[None, :]               # (in_size, hidden), no input padding
    b1f = raw["b1"] * s1 + t1
    w2f = raw["w2"] * s2[None, :]
    b2f = raw["b2"] * s2 + t2

    # Fold the lateral adapter exactly through fc3.
    wl3 = raw["wl"] @ raw["w3"]                 # (hidden, out_dim)
    b3f = raw["b3"] + raw["bl"] @ raw["w3"]     # (out_dim,)

    # Pad only the output-stage lane dim to 128 and stack the two weights.
    w3p = jnp.pad(raw["w3"], ((0, 0), (0, out_pad - out_dim)))
    wl3p = jnp.pad(wl3, ((0, 0), (0, out_pad - out_dim)))
    w23 = jnp.concatenate([w3p, wl3p], axis=0)  # (2*hidden, out_pad)

    bias_w = max(hidden, out_pad)
    bias = jnp.zeros((8, bias_w), jnp.float32)
    bias = bias.at[0, :hidden].set(b1f)
    bias = bias.at[1, :hidden].set(b2f)
    bias = bias.at[2, :out_dim].set(b3f)

    return dict(
        w1=w1f.astype(jnp.bfloat16),
        w2=w2f.astype(jnp.bfloat16),
        w23=w23.astype(jnp.bfloat16),
        bias=bias,
        in_size=in_size, out_dim=out_dim,
    )


# ---------------------------------------------------------------------------
# References
# ---------------------------------------------------------------------------
def matched_reference(x, lateral, packed):
    """Plain-JAX replica of the packed bf16 compute path (same folded weights)."""
    hidden = packed["w2"].shape[0]
    out_pad = packed["w23"].shape[1]
    b = packed["bias"]
    h = jnp.dot(x.astype(jnp.bfloat16), packed["w1"],
                preferred_element_type=jnp.float32) + b[0:1, :hidden]
    h = jnp.maximum(h, 0.0)
    h = jnp.dot(h.astype(jnp.bfloat16), packed["w2"],
                preferred_element_type=jnp.float32) + b[1:2, :hidden]
    h = jnp.maximum(h, 0.0)
    out = jnp.dot(h.astype(jnp.bfloat16), packed["w23"][:hidden, :],
                  preferred_element_type=jnp.float32)
    out = out + jnp.dot(lateral.astype(jnp.bfloat16), packed["w23"][hidden:, :],
                        preferred_element_type=jnp.float32)
    out = out + b[2:3, :out_pad]
    return out[:, :packed["out_dim"]]


def reference_forward_f32(x, lateral, raw, eps=1e-5):
    """Unfolded f32 math, exactly the PyTorch module in eval mode."""
    s1 = raw["gamma1"] / jnp.sqrt(raw["var1"] + eps)
    t1 = raw["beta1"] - raw["mean1"] * s1
    s2 = raw["gamma2"] / jnp.sqrt(raw["var2"] + eps)
    t2 = raw["beta2"] - raw["mean2"] * s2
    h = jnp.maximum((x @ raw["w1"] + raw["b1"]) * s1 + t1, 0.0)
    h = jnp.maximum((h @ raw["w2"] + raw["b2"]) * s2 + t2, 0.0)
    h = h + lateral @ raw["wl"] + raw["bl"]
    return h @ raw["w3"] + raw["b3"]


# ---------------------------------------------------------------------------
if __name__ == "__main__":
    # Small shapes consistent with the module: (B, input_size) + (B, hidden)
    B, INPUT_SIZE, HIDDEN, NEW_OUTPUT = 8, 64, 128, 8

    key = jax.random.PRNGKey(0)
    k_x, k_lat, k_p, k_x2, k_lat2 = jax.random.split(key, 5)

    x = jax.random.normal(k_x, (B, INPUT_SIZE), jnp.float32)
    lateral = jax.random.normal(k_lat, (B, HIDDEN), jnp.float32)

    raw = make_raw_params(k_p, INPUT_SIZE, HIDDEN, NEW_OUTPUT)
    packed = pack_params(raw)

    out = jax.block_until_ready(pnn_column_fc2_forward(x, lateral, packed))
    assert out.shape == (B, NEW_OUTPUT)

    # Tight check vs a plain-JAX replica of the same folded bf16 compute path.
    ref_m = matched_reference(x, lateral, packed)
    assert jnp.allclose(out, ref_m, atol=5e-3, rtol=5e-3), float(
        jnp.max(jnp.abs(out - ref_m)))

    # Loose check vs the exact f32 module semantics (bf16 rounding only).
    ref_f = reference_forward_f32(x, lateral, raw)
    assert jnp.allclose(out, ref_f, atol=2e-1, rtol=1e-1), float(
        jnp.max(jnp.abs(out - ref_f)))

    # Exercise the tiled / ragged-tail path (grid = cdiv(B, 1024), partial block).
    B2 = 1280
    x2 = jax.random.normal(k_x2, (B2, INPUT_SIZE), jnp.float32)
    lat2 = jax.random.normal(k_lat2, (B2, HIDDEN), jnp.float32)
    out2 = jax.block_until_ready(pnn_column_fc2_forward(x2, lat2, packed))
    assert out2.shape == (B2, NEW_OUTPUT)
    ref2 = matched_reference(x2, lat2, packed)
    assert jnp.allclose(out2, ref2, atol=5e-3, rtol=5e-3), float(
        jnp.max(jnp.abs(out2 - ref2)))

    print("KERNEL_OK")
</pallas_src>

<mosaic_0001>
module attributes {stable_mosaic.version = 11 : i64} {
  func.func @_pnn_column_kernel(%arg0: i32, %arg1: memref<8x64xf32, #tpu.memory_space<vmem>>, %arg2: memref<8x128xf32, #tpu.memory_space<vmem>>, %arg3: memref<64x128xbf16, #tpu.memory_space<vmem>>, %arg4: memref<128x128xbf16, #tpu.memory_space<vmem>>, %arg5: memref<256x128xbf16, #tpu.memory_space<vmem>>, %arg6: memref<8x128xf32, #tpu.memory_space<vmem>>, %arg7: memref<8x8xf32, #tpu.memory_space<vmem>>) attributes {dimension_semantics = [#tpu.dimension_semantics<parallel>], iteration_bounds = array<i64: 1>, scalar_prefetch = 0 : i64, scratch_operands = 0 : i64, tpu.core_type = #tpu.core_type<tc>, window_params = [{transform_indices = @transform_0, window_bounds = array<i64: 8, 64>}, {transform_indices = @transform_1, window_bounds = array<i64: 8, 128>}, {pipeline_mode = #tpu.pipeline_mode<synchronous>, transform_indices = @transform_2, window_bounds = array<i64: 64, 128>}, {pipeline_mode = #tpu.pipeline_mode<synchronous>, transform_indices = @transform_3, window_bounds = array<i64: 128, 128>}, {pipeline_mode = #tpu.pipeline_mode<synchronous>, transform_indices = @transform_4, window_bounds = array<i64: 256, 128>}, {pipeline_mode = #tpu.pipeline_mode<synchronous>, transform_indices = @transform_5, window_bounds = array<i64: 8, 128>}, {transform_indices = @transform_6, window_bounds = array<i64: 8, 8>}]} {
    %c0 = arith.constant 0 : index
    %c0_0 = arith.constant 0 : index
    %0 = vector.load %arg1[%c0, %c0_0] : memref<8x64xf32, #tpu.memory_space<vmem>>, vector<8x64xf32>
    %1 = arith.truncf %0 : vector<8x64xf32> to vector<8x64xbf16>
    %c0_1 = arith.constant 0 : index
    %c0_2 = arith.constant 0 : index
    %2 = vector.load %arg3[%c0_1, %c0_2] : memref<64x128xbf16, #tpu.memory_space<vmem>>, vector<64x128xbf16>
    %cst = arith.constant dense<0.000000e+00> : vector<8x128xf32>
    %3 = tpu.matmul %1, %2, %cst {dimension_numbers = #tpu.dot_dimension_numbers<[1], [0], [0], [1], [0, 0, 1, 1], [], []>} : vector<8x64xbf16>, vector<64x128xbf16>, vector<8x128xf32> -> vector<8x128xf32>
    %c0_3 = arith.constant 0 : index
    %c0_4 = arith.constant 0 : index
    %4 = vector.load %arg6[%c0_3, %c0_4] : memref<8x128xf32, #tpu.memory_space<vmem>>, vector<1x128xf32>
    %5 = vector.broadcast %4 : vector<1x128xf32> to vector<8x128xf32>
    %6 = arith.addf %3, %5 : vector<8x128xf32>
    %cst_5 = arith.constant 0.000000e+00 : f32
    %7 = vector.broadcast %cst_5 : f32 to vector<8x128xf32>
    %8 = arith.maximumf %6, %7 : vector<8x128xf32>
    %9 = arith.truncf %8 : vector<8x128xf32> to vector<8x128xbf16>
    %c0_6 = arith.constant 0 : index
    %c0_7 = arith.constant 0 : index
    %10 = vector.load %arg4[%c0_6, %c0_7] : memref<128x128xbf16, #tpu.memory_space<vmem>>, vector<128x128xbf16>
    %cst_8 = arith.constant dense<0.000000e+00> : vector<8x128xf32>
    %11 = tpu.matmul %9, %10, %cst_8 {dimension_numbers = #tpu.dot_dimension_numbers<[1], [0], [0], [1], [0, 0, 1, 1], [], []>} : vector<8x128xbf16>, vector<128x128xbf16>, vector<8x128xf32> -> vector<8x128xf32>
    %c1 = arith.constant 1 : index
    %c0_9 = arith.constant 0 : index
    %12 = vector.load %arg6[%c1, %c0_9] : memref<8x128xf32, #tpu.memory_space<vmem>>, vector<1x128xf32>
    %13 = vector.broadcast %12 : vector<1x128xf32> to vector<8x128xf32>
    %14 = arith.addf %11, %13 : vector<8x128xf32>
    %cst_10 = arith.constant 0.000000e+00 : f32
    %15 = vector.broadcast %cst_10 : f32 to vector<8x128xf32>
    %16 = arith.maximumf %14, %15 : vector<8x128xf32>
    %17 = arith.truncf %16 : vector<8x128xf32> to vector<8x128xbf16>
    %c0_11 = arith.constant 0 : index
    %c0_12 = arith.constant 0 : index
    %18 = vector.load %arg5[%c0_11, %c0_12] : memref<256x128xbf16, #tpu.memory_space<vmem>>, vector<128x128xbf16>
    %cst_13 = arith.constant dense<0.000000e+00> : vector<8x128xf32>
    %19 = tpu.matmul %17, %18, %cst_13 {dimension_numbers = #tpu.dot_dimension_numbers<[1], [0], [0], [1], [0, 0, 1, 1], [], []>} : vector<8x128xbf16>, vector<128x128xbf16>, vector<8x128xf32> -> vector<8x128xf32>
    %c0_14 = arith.constant 0 : index
    %c0_15 = arith.constant 0 : index
    %20 = vector.load %arg2[%c0_14, %c0_15] : memref<8x128xf32, #tpu.memory_space<vmem>>, vector<8x128xf32>
    %21 = arith.truncf %20 : vector<8x128xf32> to vector<8x128xbf16>
    %c128 = arith.constant 128 : index
    %c0_16 = arith.constant 0 : index
    %22 = vector.load %arg5[%c128, %c0_16] : memref<256x128xbf16, #tpu.memory_space<vmem>>, vector<128x128xbf16>
    %cst_17 = arith.constant dense<0.000000e+00> : vector<8x128xf32>
    %23 = tpu.matmul %21, %22, %cst_17 {dimension_numbers = #tpu.dot_dimension_numbers<[1], [0], [0], [1], [0, 0, 1, 1], [], []>} : vector<8x128xbf16>, vector<128x128xbf16>, vector<8x128xf32> -> vector<8x128xf32>
    %24 = arith.addf %19, %23 : vector<8x128xf32>
    %c2 = arith.constant 2 : index
    %c0_18 = arith.constant 0 : index
    %25 = vector.load %arg6[%c2, %c0_18] : memref<8x128xf32, #tpu.memory_space<vmem>>, vector<1x128xf32>
    %26 = vector.broadcast %25 : vector<1x128xf32> to vector<8x128xf32>
    %27 = arith.addf %24, %26 : vector<8x128xf32>
    %28 = vector.extract_strided_slice %27 {offsets = [0, 0], sizes = [8, 8], strides = [1, 1]} : vector<8x128xf32> to vector<8x8xf32>
    %c0_19 = arith.constant 0 : index
    %c0_20 = arith.constant 0 : index
    %29 = vector.load %arg7[%c0_19, %c0_20] : memref<8x8xf32, #tpu.memory_space<vmem>>, vector<8x8xf32>
    tpu.vector_store %arg7[%c0_19, %c0_20], %28 {strides = array<i32>} : memref<8x8xf32, #tpu.memory_space<vmem>>, vector<8x8xf32>,
    return
  }
  func.func @transform_0(%arg0: i32) -> (i32, i32) {
    %c0_i32 = arith.constant 0 : i32
    %c0_i32_0 = arith.constant 0 : i32
    return %arg0, %c0_i32 : i32, i32
  }
  func.func @transform_1(%arg0: i32) -> (i32, i32) {
    %c0_i32 = arith.constant 0 : i32
    %c0_i32_0 = arith.constant 0 : i32
    return %arg0, %c0_i32 : i32, i32
  }
  func.func @transform_2(%arg0: i32) -> (i32, i32) {
    %c0_i32 = arith.constant 0 : i32
    %c0_i32_0 = arith.constant 0 : i32
    %c0_i32_1 = arith.constant 0 : i32
    return %c0_i32, %c0_i32_0 : i32, i32
  }
  func.func @transform_3(%arg0: i32) -> (i32, i32) {
    %c0_i32 = arith.constant 0 : i32
    %c0_i32_0 = arith.constant 0 : i32
    %c0_i32_1 = arith.constant 0 : i32
    return %c0_i32, %c0_i32_0 : i32, i32
  }
  func.func @transform_4(%arg0: i32) -> (i32, i32) {
    %c0_i32 = arith.constant 0 : i32
    %c0_i32_0 = arith.constant 0 : i32
    %c0_i32_1 = arith.constant 0 : i32
    return %c0_i32, %c0_i32_0 : i32, i32
  }
  func.func @transform_5(%arg0: i32) -> (i32, i32) {
    %c0_i32 = arith.constant 0 : i32
    %c0_i32_0 = arith.constant 0 : i32
    %c0_i32_1 = arith.constant 0 : i32
    return %c0_i32, %c0_i32_0 : i32, i32
  }
  func.func @transform_6(%arg0: i32) -> (i32, i32) {
    %c0_i32 = arith.constant 0 : i32
    %c0_i32_0 = arith.constant 0 : i32
    return %arg0, %c0_i32 : i32, i32
  }
}

</mosaic_0001>

<bundles_post_ra>
// kernel: tpu_custom_call.1
= control target key start
LH: loop header
LB: loop body
LE: loop exit
PB: predicated region body
PF: predicated region fallthrough
CT: control target
= control target key end

     0   :  { %11 = vsyncpa [#allocation3], 0  ;;  %s939_s0 = inlined_call_operand.hbm [shape: f32[8,64], index: 0, kind: input, shape index: {}]   ;;  %s940_s1 = inlined_call_operand.hbm [shape: f32[8,128], index: 1, kind: input, shape index: {}]   ;;  %s941_s2 = inlined_call_operand.hbm [shape: bf16[64,128], index: 2, kind: input, shape index: {}]   ;;  %s942_s3 = inlined_call_operand.hbm [shape: bf16[128,128], index: 3, kind: input, shape index: {}]   ;;  %s943_s4 = inlined_call_operand.hbm [shape: bf16[256,128], index: 4, kind: input, shape index: {}]   ;;  %s944_s5 = inlined_call_operand.vmem [shape: f32[8,128], index: 5, kind: input, shape index: {}]   ;;  %s945_s6 = inlined_call_operand.hbm [shape: f32[8,8], index: 6, kind: output, shape index: {}]  }
   0x1   :  { %12 = vsyncpa [#allocation6], 0 }
   0x2   :  { %13 = vsyncpa [#allocation9], 0 }
   0x3   :  { %14 = vsyncpa [#allocation4], 0  ;;  %s822_s21 = smov [#allocation5]  }
   0x4   :  { %s31_s22 = sshll.u32 %s822_s21, 4  ;;  %s32_s22 = int_to_ptr.vmem [resolvable:$true] %s31_s22 }
   0x5   :  { %s702_s23 = scalar_lea.vmem %s32_s22, 128  ;;  %p707_p1 = scmp.lt.s32.totalorder %s32_s22, %s32_s22 }
   0x6   :  { %p703_p0 = scmp.ne.s32.totalorder %s32_s22, %s702_s23  ;;  %p708_p2 = scmp.lt.s32.totalorder %s702_s23, %s702_s23 }
   0x8   :  { %p709_p3 = por %p708_p2, %p707_p1 }
   0xa   :  { %p710_p4 = pnand %p709_p3, %p703_p0 }
   0xc   :  { %713 = shalt.err (!%p710_p4)
}
   0xd   :  { %34 = dma.hbm_to_vmem [thread:$0]  %s940_s1, 128, %s32_s22, [#allocation6]  }
   0xe   :  { %s823_s26 = smov [#allocation8]   ;;  %s824_s28 = smov [#allocation2]  }
   0xf   :  { %s52_s27 = sshll.u32 %s823_s26, 4  ;;  %s21_s29 = sshll.u32 %s824_s28, 4  ;;  %s53_s27 = int_to_ptr.vmem [resolvable:$true] %s52_s27  ;;  %s22_s29 = int_to_ptr.vmem [resolvable:$true] %s21_s29 }
  0x10   :  { %s722_s30 = scalar_lea.vmem %s53_s27, 1024  ;;  %p727_p6 = scmp.lt.s32.totalorder %s53_s27, %s53_s27 }
  0x11   :  { %p723_p5 = scmp.ne.s32.totalorder %s53_s27, %s722_s30  ;;  %p728_p7 = scmp.lt.s32.totalorder %s722_s30, %s722_s30 }
  0x13   :  { %p729_p8 = por %p728_p7, %p727_p6 }
  0x15   :  { %p730_p9 = pnand %p729_p8, %p723_p5 }
  0x17   :  { %733 = shalt.err (!%p730_p9)
}
  0x18   :  { %s825_s7 = smov 64   ;;  %s826_s8 = smov 4  }
  0x19   :  { %58 = dma.hbm_to_vmem [thread:$0]  %s942_s3, 1024, %s53_s27, [#allocation9], %s825_s7, %s825_s7, %s826_s8  }
  0x1a   :  { %s742_s1 = scalar_lea.vmem %s22_s29, 128  ;;  %p747_p11 = scmp.lt.s32.totalorder %s22_s29, %s22_s29 }
  0x1b   :  { %p743_p10 = scmp.ne.s32.totalorder %s22_s29, %s742_s1  ;;  %p748_p12 = scmp.lt.s32.totalorder %s742_s1, %s742_s1 }
  0x1d   :  { %p749_p13 = por %p748_p12, %p747_p11 }
  0x1f   :  { %p750_p0 = pnand %p749_p13, %p743_p10 }
  0x21   :  { %753 = shalt.err (!%p750_p0)
}
  0x22   :  { %24 = dma.hbm_to_vmem [thread:$0]  %s939_s0, 128, %s22_s29, [#allocation3]  }
  0x23   :  { %s827_s13 = smov [#allocation7]   ;;  %s828_s15 = smov [#allocation10]  }
  0x24   :  { %s40_s14 = sshll.u32 %s827_s13, 4  ;;  %s64_s16 = sshll.u32 %s828_s15, 4  ;;  %s41_s14 = int_to_ptr.vmem [resolvable:$true] %s40_s14  ;;  %s65_s16 = int_to_ptr.vmem [resolvable:$true] %s64_s16 }
  0x25   :  { %s762_s17 = scalar_lea.vmem %s41_s14, 512  ;;  %p767_p2 = scmp.lt.s32.totalorder %s41_s14, %s41_s14 }
  0x26   :  { %p763_p1 = scmp.ne.s32.totalorder %s41_s14, %s762_s17  ;;  %p768_p3 = scmp.lt.s32.totalorder %s762_s17, %s762_s17 }
  0x28   :  { %p769_p4 = por %p768_p3, %p767_p2 }
  0x2a   :  { %p770_p5 = pnand %p769_p4, %p763_p1 }
  0x2c   :  { %773 = shalt.err (!%p770_p5)
}
  0x2d   :  { %46 = dma.hbm_to_vmem [thread:$0]  %s941_s2, 512, %s41_s14, [#allocation6], %s825_s7, %s825_s7, %s826_s8  }
  0x2e   :  { %s782_s0 = scalar_lea.vmem %s65_s16, 2048  ;;  %p787_p7 = scmp.lt.s32.totalorder %s65_s16, %s65_s16 }
  0x2f   :  { %p783_p6 = scmp.ne.s32.totalorder %s65_s16, %s782_s0  ;;  %p788_p8 = scmp.lt.s32.totalorder %s782_s0, %s782_s0 }
  0x31   :  { %p789_p9 = por %p788_p8, %p787_p7 }
  0x33   :  { %p790_p10 = pnand %p789_p9, %p783_p6 }
  0x35   :  { %793 = shalt.err (!%p790_p10)
}
  0x36   :  { %70 = dma.hbm_to_vmem [thread:$0]  %s943_s4, 2048, %s65_s16, [#allocation9], %s825_s7, %s825_s7, %s826_s8  }
  0x37   :  { %814 = dma.done.wait [#allocation3], 128  }
  0x38   :  { %815 = vsyncadd [#allocation3], 4294967168 }
  0x39   :  { %816 = dma.done.wait [#allocation6], 640  }
  0x3a   :  { %817 = vsyncadd [#allocation6], 4294966656 }
  0x3b   :  { %818 = dma.done.wait [#allocation9], 3072  }
  0x3c   :  { %819 = vsyncadd [#allocation9], 4294964224  ;;  %v829_v0 = vmov 0.0   ;;  %vm830_vm0 = vmmov 0   ;;  %v666_v1 = vld [vmem:[#allocation7 + $0x18] sm:$0xff]   ;;  %v667_v2 = vld [vmem:[#allocation7 + $0x10] sm:$0xff]  }
  0x3d   :  { %584 = vmatprep.subr.bf16.mxu0 %v829_v0  ;;  %592 = vmatprep.mubr.msk.bf16.mxu0 %vm830_vm0, %v829_v0  ;;  %v670_v3 = vld [vmem:[#allocation8 + $0x38] sm:$0xff]   ;;  %v668_v4 = vld [vmem:[#allocation7 + $0x8] sm:$0xff]   ;;  %v671_v5 = vld [vmem:[#allocation8 + $0x30] sm:$0xff]   ;;  %vm128_vm1 = vcmask 523264   ;;  %s831_s25 = smov [#allocation11]   ;;  %vm501_vm2 = vcmask 64512  }
  0x3e   :  { %596 = vmatprep.subr.bf16.mxu1 %v829_v0  ;;  %612 = vmatprep.mubr.msk.bf16.mxu1 %vm830_vm0, %v829_v0  ;;  %v669_v6 = vld [vmem:[#allocation7] sm:$0xff]   ;;  %v89_v7 = vld [vmem:[#allocation2] sm:$0xff]  ;;  %v672_v8 = vld [vmem:[#allocation8 + $0x28] sm:$0xff]   ;;  %s509_s26 = sshll.u32 %s831_s25, 4  ;;  %s510_s26 = int_to_ptr.vmem [resolvable:$true] %s509_s26 }
  0x3f   :  { %585 = vmatpush3.bf16.msra.mxu0 %v666_v1  ;;  %597 = vmatpush3.bf16.msra.mxu1 %v670_v3  ;;  %v90_v9 = vpack.c.bf16 %v89_v7, %v89_v7  ;;  %v673_v10 = vld [vmem:[#allocation8 + $0x20] sm:$0xff]   ;;  %v674_v11 = vld [vmem:[#allocation8 + $0x18] sm:$0xff]   ;;  %v675_v12 = vld [vmem:[#allocation8 + $0x10] sm:$0xff]   ;;  %s794_s27 = scalar_lea.vmem %s510_s26, 128  ;;  %p799_p12 = scmp.lt.s32.totalorder %s510_s26, %s510_s26 }
  0x40   :  { %586 = vmatprep.subr.bf16.mxu0 %v829_v0  ;;  %598 = vmatprep.subr.bf16.mxu1 %v829_v0  ;;  %v676_v13 = vld [vmem:[#allocation8 + $0x8] sm:$0xff]   ;;  %v677_v14 = vld [vmem:[#allocation8] sm:$0xff]   ;;  %v678_v15 = vld [vmem:[#allocation10 + $0x78] sm:$0xff]   ;;  %p795_p11 = scmp.ne.s32.totalorder %s510_s26, %s794_s27  ;;  %p800_p13 = scmp.lt.s32.totalorder %s794_s27, %s794_s27 }
  0x41   :  { %v679_v16 = vld [vmem:[#allocation10 + $0x70] sm:$0xff]   ;;  %v681_v17 = vld [vmem:[#allocation10 + $0x68] sm:$0xff]   ;;  %v683_v18 = vld [vmem:[#allocation10 + $0x60] sm:$0xff]  }
  0x42   :  { %v685_v19 = vld [vmem:[#allocation10 + $0x58] sm:$0xff]   ;;  %v687_v20 = vld [vmem:[#allocation10 + $0x50] sm:$0xff]   ;;  %v689_v21 = vld [vmem:[#allocation10 + $0x48] sm:$0xff]   ;;  %p801_p0 = por %p800_p13, %p799_p12 }
  0x43   :  { %587 = vmatpush3.bf16.msra.mxu0 %v667_v2  ;;  %599 = vmatpush3.bf16.msra.mxu1 %v671_v5  ;;  %v691_v22 = vld [vmem:[#allocation10 + $0x40] sm:$0xff]   ;;  %v520_v23 = vld [vmem:[%s944_s5] ss:$0 sm:$0xff]  ;;  %v680_v29 = vld [vmem:[#allocation10 + $0x38] sm:$0xff]  }
  0x44   :  { %588 = vmatprep.subr.bf16.mxu0 %v829_v0  ;;  %600 = vmatprep.subr.bf16.mxu1 %v829_v0  ;;  %v682_v32 = vld [vmem:[#allocation10 + $0x30] sm:$0xff]   ;;  %v684_v33 = vld [vmem:[#allocation10 + $0x28] sm:$0xff]   ;;  %v686_v34 = vld [vmem:[#allocation10 + $0x20] sm:$0xff]   ;;  %p802_p1 = pnand %p801_p0, %p795_p11 }
  0x45   :  { %v688_v35 = vld [vmem:[#allocation10 + $0x18] sm:$0xff]   ;;  %v690_v36 = vld [vmem:[#allocation10 + $0x10] sm:$0xff]   ;;  %v692_v37 = vld [vmem:[#allocation10 + $0x8] sm:$0xff]  }
  0x46   :  { %v301_v38 = vld [vmem:[#allocation5] sm:$0xff]  ;;  %v693_v40 = vld [vmem:[#allocation10] sm:$0xff]   ;;  %v526_v41 = vld [vmem:[%s944_s5 + $0x1] ss:$0 sm:$0xff] }
  0x47   :  { %589 = vmatpush3.bf16.msra.mxu0 %v668_v4  ;;  %601 = vmatpush3.bf16.msra.mxu1 %v672_v8  ;;  %v302_v39 = vpack.c.bf16 %v301_v38, %v301_v38  ;;  %v551_v54 = vld [vmem:[%s944_s5 + $0x2] ss:$0 sm:$0xff] }
  0x48   :  { %590 = vmatprep.subr.bf16.mxu0 %v829_v0  ;;  %602 = vmatprep.subr.bf16.mxu1 %v829_v0 }
  0x4b   :  { %591 = vmatpush3.bf16.msra.mxu0 %v669_v6  ;;  %603 = vmatpush3.bf16.msra.mxu1 %v673_v10 }
  0x4c   :  { %616 = vmatprep.subr.bf16.mxu0 %v829_v0  ;;  %604 = vmatprep.subr.bf16.mxu1 %v829_v0 }
  0x4e   :  { %593 = vmatmul.mubr.msk.bf16.vlgmr.msra.gmra.mxu0 %vm128_vm1, %v90_v9 }
  0x4f   :  { %632 = vmatprep.mubr.msk.bf16.mxu0 %vm830_vm0, %v829_v0  ;;  %605 = vmatpush3.bf16.msra.mxu1 %v674_v11 }
  0x50   :  { %606 = vmatprep.subr.bf16.mxu1 %v829_v0  ;;  %617 = vmatpush3.bf16.msra.mxu0 %v678_v15 }
  0x51   :  { %618 = vmatprep.subr.bf16.mxu0 %v829_v0 }
  0x53   :  { %607 = vmatpush3.bf16.msra.mxu1 %v675_v12 }
  0x54   :  { %608 = vmatprep.subr.bf16.mxu1 %v829_v0  ;;  %619 = vmatpush3.bf16.msra.mxu0 %v679_v16 }
  0x55   :  { %620 = vmatprep.subr.bf16.mxu0 %v829_v0 }
  0x57   :  { %609 = vmatpush3.bf16.msra.mxu1 %v676_v13 }
  0x58   :  { %610 = vmatprep.subr.bf16.mxu1 %v829_v0  ;;  %621 = vmatpush3.bf16.msra.mxu0 %v681_v17 }
  0x59   :  { %622 = vmatprep.subr.bf16.mxu0 %v829_v0 }
  0x5b   :  { %611 = vmatpush3.bf16.msra.mxu1 %v677_v14 }
  0x5c   :  { %636 = vmatprep.subr.bf16.mxu1 %v829_v0  ;;  %623 = vmatpush3.bf16.msra.mxu0 %v683_v18 }
  0x5d   :  { %624 = vmatprep.subr.bf16.mxu0 %v829_v0 }
  0x60   :  { %625 = vmatpush3.bf16.msra.mxu0 %v685_v19 }
  0x61   :  { %626 = vmatprep.subr.bf16.mxu0 %v829_v0 }
  0x64   :  { %627 = vmatpush3.bf16.msra.mxu0 %v687_v20 }
  0x65   :  { %628 = vmatprep.subr.bf16.mxu0 %v829_v0 }
  0x68   :  { %629 = vmatpush3.bf16.msra.mxu0 %v689_v21 }
  0x69   :  { %630 = vmatprep.subr.bf16.mxu0 %v829_v0 }
  0x6c   :  { %631 = vmatpush3.bf16.msra.mxu0 %v691_v22 }
  0x6f   :  { %633 = vmatmul.mubr.bf16.vlgmr.msra.gmra.mxu0 %v302_v39 }
 0x10e   :  { %v166_v24 = vpop.f32.mrf.mxu0 }
 0x10f   :  { %v167_v25 = vadd.f32 %v520_v23, %v166_v24 }
 0x110   :  { %v594_v26 = vpop.f32.mrf.mxu0 }
 0x111   :  { %v172_v27 = vmax.f32 %v167_v25, 0.0 }
 0x112   :  { %v169_v28 = vpop.f32.mrf.mxu0 }
 0x113   :  { %v173_v30 = vpack.c.bf16 %v172_v27, %v172_v27 }
 0x114   :  { %v595_v31 = vpop.f32.mrf.mxu0 }
 0x115   :  { %613 = vmatmul.mubr.bf16.vlgmr.msra.gmra.mxu1 %v173_v30 }
 0x116   :  { %637 = vmatpush3.bf16.msra.mxu1 %v680_v29  ;;  %652 = vmatprep.mubr.msk.bf16.mxu1 %vm830_vm0, %v829_v0 }
 0x117   :  { %638 = vmatprep.subr.bf16.mxu1 %v829_v0 }
 0x11a   :  { %639 = vmatpush3.bf16.msra.mxu1 %v682_v32 }
 0x11b   :  { %640 = vmatprep.subr.bf16.mxu1 %v829_v0 }
 0x11e   :  { %641 = vmatpush3.bf16.msra.mxu1 %v684_v33 }
 0x11f   :  { %642 = vmatprep.subr.bf16.mxu1 %v829_v0 }
 0x122   :  { %643 = vmatpush3.bf16.msra.mxu1 %v686_v34 }
 0x123   :  { %644 = vmatprep.subr.bf16.mxu1 %v829_v0 }
 0x126   :  { %645 = vmatpush3.bf16.msra.mxu1 %v688_v35 }
 0x127   :  { %646 = vmatprep.subr.bf16.mxu1 %v829_v0 }
 0x12a   :  { %647 = vmatpush3.bf16.msra.mxu1 %v690_v36 }
 0x12b   :  { %648 = vmatprep.subr.bf16.mxu1 %v829_v0 }
 0x12e   :  { %649 = vmatpush3.bf16.msra.mxu1 %v692_v37 }
 0x12f   :  { %650 = vmatprep.subr.bf16.mxu1 %v829_v0  ;;  %v401_v49 = vpop.f32.mrf.mxu0 }
 0x131   :  { %v634_v50 = vpop.f32.mrf.mxu0 }
 0x132   :  { %651 = vmatpush3.bf16.msra.mxu1 %v693_v40 }
 0x133   :  { %v404_v51 = vpop.f32.mrf.mxu0 }
 0x135   :  { %v635_v52 = vpop.f32.mrf.mxu0 }
 0x1d5   :  { %v277_v42 = vpop.f32.mrf.mxu1 }
 0x1d6   :  { %v278_v43 = vadd.f32 %v526_v41, %v277_v42 }
 0x1d7   :  { %v614_v44 = vpop.f32.mrf.mxu1 }
 0x1d8   :  { %v283_v45 = vmax.f32 %v278_v43, 0.0 }
 0x1d9   :  { %v280_v46 = vpop.f32.mrf.mxu1 }
 0x1da   :  { %v284_v47 = vpack.c.bf16 %v283_v45, %v283_v45 }
 0x1db   :  { %v615_v48 = vpop.f32.mrf.mxu1 }
 0x1dc   :  { %653 = vmatmul.mubr.bf16.vlgmr.msra.gmra.mxu1 %v284_v47 }
 0x29c   :  { %v489_v53 = vpop.f32.mrf.mxu1 }
 0x29d   :  { %v490_v55 = vadd.f32 %v489_v53, %v401_v49 }
 0x29e   :  { %v654_v56 = vpop.f32.mrf.mxu1 }
 0x29f   :  { %v500_v57 = vadd.f32 %v551_v54, %v490_v55 }
 0x2a0   :  { %v492_v58 = vpop.f32.mrf.mxu1 }
 0x2a1   :  { %502 = vst.msk [vmem:[#allocation11] sm:$0xff] %vm501_vm2, %v500_v57 }
 0x2a2   :  { %v655_v59 = vpop.f32.mrf.mxu1 }
 0x2a3   :  { %805 = shalt.err (!%p802_p1)
}
 0x2a4   :  { %512 = dma.vmem_to_hbm [thread:$0]  %s510_s26, 128, %s945_s6, [#allocation4]  }
 0x2a5   :  { %820 = dma.done.wait [#allocation4], 128  }
 0x2a6   :  { %821 = vsyncadd [#allocation4], 4294967168 }
 0x2a7   :  { %516 = vsyncpa [#allocation3], 1 }
 0x2a8   :  { %517 = vsyncpa [#allocation6], 1 }
 0x2a9   :  { %518 = vsyncpa [#allocation9], 1 }
 0x2aa   :  { %519 = vsyncpa [#allocation4], 1 }

</bundles_post_ra>
